<compile_context>
chip_gen: v7x
topology: tpu7x:2x2x1
jax: 0.10.0
libtpu: 0.0.40
codegen_flags: <defaults>
</compile_context>

<pallas_src>
import jax
import jax.numpy as jnp
from jax.experimental import pallas as pl
from jax.experimental.pallas import tpu as pltpu


def _round_up(x, m):
    return ((x + m - 1) // m) * m


def _pad2(a, rows, cols):
    r, c = a.shape
    return jnp.pad(a, ((0, rows - r), (0, cols - c)))


def _tensorcores_per_chip():
    """2 on v7x (TCs share the 'parallel' grid axis), else 1 (v5e/v6e)."""
    try:
        kind = jax.devices()[0].device_kind.lower()
    except Exception:
        return 1
    return 2 if "7" in kind else 1


def _select_tiling(B, batch_tile, n_cores):
    """Pick a lane-aligned batch tile; batch lives on the 128-lane axis."""
    Bp0 = _round_up(B, 128)
    # Clamp: >= 128, multiple of 128, <= 16384 (v5e scoped-VMEM safe region).
    t_max = min(max(128, (batch_tile // 128) * 128), 16384)
    n_steps = pl.cdiv(Bp0, t_max)
    if n_cores > 1:
        # v7x only: keep >= 2 steps and an even step count so both TCs get
        # balanced work.  On single-TC chips this would just add overhead.
        if n_steps == 1 and Bp0 >= 256:
            n_steps = 2
        elif n_steps > 1 and n_steps % 2 == 1:
            n_steps += 1
    tile = _round_up(pl.cdiv(Bp0, n_steps), 128)
    Bp = n_steps * tile
    return tile, Bp, n_steps


def make_mmlp_kernel(n_hidden, hp, compute_dtype):
    """Kernel factory; mixing layers are unrolled at trace time."""
    n_rest = max(n_hidden - 1, 0)

    def kernel(*refs):
        x_ref = refs[0]
        w0_ref, b0_ref = refs[1], refs[2]
        rest = refs[3:3 + 2 * n_rest]
        w_out_ref = refs[3 + 2 * n_rest]
        out_ref = refs[4 + 2 * n_rest]

        x = x_ref[...]                                   # (d_in, T), batch on lanes

        # One stacked MXU issue + one sublane-dense tanh covers encoder_u,
        # encoder_v (and hidden layer 1 when present).
        pre0 = jnp.dot(w0_ref[...], x, preferred_element_type=jnp.float32) + b0_ref[...]
        z0 = jnp.tanh(pre0.astype(compute_dtype))
        u = z0[0 * hp:1 * hp, :]
        v = z0[1 * hp:2 * hp, :]

        if n_hidden > 0:
            z = z0[2 * hp:3 * hp, :] * 0.5               # X / 2.0
            h = (1.0 - z) * u + z * v                    # mixing with encoders
            for i in range(n_rest):
                w_ref = rest[2 * i]
                b_ref = rest[2 * i + 1]
                pre = (jnp.dot(w_ref[...].astype(compute_dtype), h,
                               preferred_element_type=jnp.float32) + b_ref[...])
                z = jnp.tanh(pre.astype(compute_dtype)) * 0.5
                h = (1.0 - z) * u + z * v
        else:
            h = x                                        # no mixing layers

        out = jnp.dot(w_out_ref[...].astype(compute_dtype), h,
                      preferred_element_type=jnp.float32)
        out_ref[...] = out.astype(out_ref.dtype)         # lane-dense (d_out, T) store

    return kernel


def modified_mlp_forward(x, params, *, batch_tile=8192,
                         compute_dtype=jnp.float32, x_transposed=False):
    """ModifiedMLP forward.

    x: (B, d_in) f32 -> (B, d_out) f32.  If x_transposed=True, x is (d_in, B)
    and the result is (d_out, B) -- use this to keep a (feature, batch) layout
    across the whole training step and skip the wrapper-side transpose.
    """
    wu, bu, wv, bv = params["wu"], params["bu"], params["wv"], params["bv"]
    ws, bs = params["ws"], params["bs"]
    w_out = params["w_out"]

    if x_transposed:
        d_in, B = x.shape
        xT = x.astype(jnp.float32)
    else:
        B, d_in = x.shape
        xT = x.astype(jnp.float32).T       # one-time layout change (XLA op)

    d_out = w_out.shape[0]
    n_hidden = len(ws)
    h1 = wu.shape[0]
    hp = _round_up(h1, 8)                  # sublane-aligned hidden width

    # ---- pack / pad parameters (tiny, host-side, zero-padded rows are inert) ----
    stack_w = [_pad2(wu, hp, d_in), _pad2(wv, hp, d_in)]
    stack_b = [_pad2(bu, hp, 1), _pad2(bv, hp, 1)]
    if n_hidden > 0:
        stack_w.append(_pad2(ws[0], hp, d_in))
        stack_b.append(_pad2(bs[0], hp, 1))
    w0 = jnp.concatenate(stack_w, axis=0)
    b0 = jnp.concatenate(stack_b, axis=0)
    rest_w = [_pad2(w, hp, hp) for w in ws[1:]]
    rest_b = [_pad2(b, hp, 1) for b in bs[1:]]
    k_out = hp if n_hidden > 0 else d_in
    w_out_p = _pad2(w_out, d_out, k_out)

    # ---- batch tiling (EUP-bound: big tiles amortize ~0.35us/step overhead) ----
    tile, Bp, _ = _select_tiling(B, batch_tile, _tensorcores_per_chip())
    if Bp != B:
        xT = jnp.pad(xT, ((0, 0), (0, Bp - B)))
    grid = (Bp // tile,)

    def full(a):
        # weights/biases are tiny: full blocks, constant index -> stay resident
        return pl.BlockSpec(a.shape, lambda i: (0, 0))

    in_specs = [pl.BlockSpec((d_in, tile), lambda i: (0, i)), full(w0), full(b0)]
    args = [xT, w0, b0]
    for w, b in zip(rest_w, rest_b):
        in_specs += [full(w), full(b)]
        args += [w, b]
    in_specs.append(full(w_out_p))
    args.append(w_out_p)

    # Advisory cost estimate (kernel is EUP/transcendental-bound).
    flops = 2 * d_in * w0.shape[0] * Bp
    trans = w0.shape[0] * Bp
    if n_hidden > 0:
        flops += 6 * hp * Bp
    for _ in rest_w:
        flops += (2 * hp * hp + 6 * hp) * Bp
        trans += hp * Bp
    flops += 2 * k_out * d_out * Bp
    n_weight_elems = sum(int(a.size) for a in args[1:])
    cost = pl.CostEstimate(
        flops=int(flops),
        transcendentals=int(trans),
        bytes_accessed=int(4 * (Bp * (d_in + d_out) + n_weight_elems)))

    # Raise the scoped-VMEM limit only for very large tiles (v5e default 16 MiB).
    vmem_limit = (32 * 1024 * 1024) if tile > 8192 else None

    out_t = pl.pallas_call(
        make_mmlp_kernel(n_hidden, hp, compute_dtype),
        out_shape=jax.ShapeDtypeStruct((d_out, Bp), jnp.float32),
        grid_spec=pltpu.PrefetchScalarGridSpec(
            num_scalar_prefetch=0,
            grid=grid,
            in_specs=in_specs,
            out_specs=pl.BlockSpec((d_out, tile), lambda i: (0, i)),
        ),
        compiler_params=pltpu.CompilerParams(
            dimension_semantics=("parallel",),
            vmem_limit_bytes=vmem_limit),
        cost_estimate=cost,
    )(*args)

    out_t = out_t[:, :B]                    # drop padded lanes
    return out_t if x_transposed else out_t.T


def init_mmlp_params(key, nn_layers):
    """Deterministic xavier_normal weights (PyTorch (out, in) layout), zero biases."""
    def xavier_normal(k, fan_out, fan_in):
        std = (2.0 / (fan_in + fan_out)) ** 0.5
        return std * jax.random.normal(k, (fan_out, fan_in), dtype=jnp.float32)

    n_hidden = len(nn_layers) - 2
    ks = jax.random.split(key, 3 + n_hidden)
    h1 = nn_layers[1]
    params = {
        "wu": xavier_normal(ks[0], h1, nn_layers[0]),
        "bu": jnp.zeros((h1, 1), jnp.float32),
        "wv": xavier_normal(ks[1], h1, nn_layers[0]),
        "bv": jnp.zeros((h1, 1), jnp.float32),
        "ws": [],
        "bs": [],
    }
    for i in range(n_hidden):
        params["ws"].append(xavier_normal(ks[2 + i], nn_layers[i + 1], nn_layers[i]))
        params["bs"].append(jnp.zeros((nn_layers[i + 1], 1), jnp.float32))
    params["w_out"] = xavier_normal(ks[2 + n_hidden], nn_layers[-1], nn_layers[-2])
    return params


def modified_mlp_reference(x, params):
    """Pure-JAX reference matching the PyTorch ModifiedMLP forward."""
    u = jnp.tanh(x @ params["wu"].T + params["bu"].T)
    v = jnp.tanh(x @ params["wv"].T + params["bv"].T)
    h = x
    for w, b in zip(params["ws"], params["bs"]):
        z = jnp.tanh(h @ w.T + b.T)
        z = z / 2.0
        h = (1.0 - z) * u + z * v
    return h @ params["w_out"].T


if __name__ == "__main__":
    NN_LAYERS = [2, 20, 20, 1]   # module's documented example

    key = jax.random.PRNGKey(0)
    k_params, k_x1, k_x2 = jax.random.split(key, 3)
    params = init_mmlp_params(k_params, NN_LAYERS)

    # lane-aligned batch
    x1 = jax.random.normal(k_x1, (256, NN_LAYERS[0]), dtype=jnp.float32)
    out1 = jax.block_until_ready(modified_mlp_forward(x1, params))
    ref1 = modified_mlp_reference(x1, params)
    assert out1.shape == (256, NN_LAYERS[-1])
    assert jnp.allclose(out1, ref1, atol=1e-5, rtol=1e-5), "mismatch vs reference (256)"

    # ragged batch (exercises lane padding / un-padding)
    x2 = jax.random.normal(k_x2, (200, NN_LAYERS[0]), dtype=jnp.float32)
    out2 = jax.block_until_ready(modified_mlp_forward(x2, params))
    ref2 = modified_mlp_reference(x2, params)
    assert out2.shape == (200, NN_LAYERS[-1])
    assert jnp.allclose(out2, ref2, atol=1e-5, rtol=1e-5), "mismatch vs reference (200)"

    print("KERNEL_OK")
</pallas_src>

<mosaic_0001>
module attributes {stable_mosaic.version = 11 : i64} {
  func.func @kernel(%arg0: i32, %arg1: memref<2x256xf32, #tpu.memory_space<vmem>>, %arg2: memref<72x2xf32, #tpu.memory_space<vmem>>, %arg3: memref<72x1xf32, #tpu.memory_space<vmem>>, %arg4: memref<24x24xf32, #tpu.memory_space<vmem>>, %arg5: memref<24x1xf32, #tpu.memory_space<vmem>>, %arg6: memref<1x24xf32, #tpu.memory_space<vmem>>, %arg7: memref<1x256xf32, #tpu.memory_space<vmem>>) attributes {dimension_semantics = [#tpu.dimension_semantics<parallel>], iteration_bounds = array<i64: 1>, scalar_prefetch = 0 : i64, scratch_operands = 0 : i64, tpu.core_type = #tpu.core_type<tc>, window_params = [{transform_indices = @transform_0, window_bounds = array<i64: 2, 256>}, {pipeline_mode = #tpu.pipeline_mode<synchronous>, transform_indices = @transform_1, window_bounds = array<i64: 72, 2>}, {pipeline_mode = #tpu.pipeline_mode<synchronous>, transform_indices = @transform_2, window_bounds = array<i64: 72, 1>}, {pipeline_mode = #tpu.pipeline_mode<synchronous>, transform_indices = @transform_3, window_bounds = array<i64: 24, 24>}, {pipeline_mode = #tpu.pipeline_mode<synchronous>, transform_indices = @transform_4, window_bounds = array<i64: 24, 1>}, {pipeline_mode = #tpu.pipeline_mode<synchronous>, transform_indices = @transform_5, window_bounds = array<i64: 1, 24>}, {transform_indices = @transform_6, window_bounds = array<i64: 1, 256>}]} {
    %c0 = arith.constant 0 : index
    %c0_0 = arith.constant 0 : index
    %0 = vector.load %arg1[%c0, %c0_0] : memref<2x256xf32, #tpu.memory_space<vmem>>, vector<2x256xf32>
    %c0_1 = arith.constant 0 : index
    %c0_2 = arith.constant 0 : index
    %1 = vector.load %arg2[%c0_1, %c0_2] : memref<72x2xf32, #tpu.memory_space<vmem>>, vector<72x2xf32>
    %cst = arith.constant dense<0.000000e+00> : vector<72x256xf32>
    %2 = tpu.matmul %1, %0, %cst {dimension_numbers = #tpu.dot_dimension_numbers<[1], [0], [0], [1], [0, 0, 1, 1], [], []>} : vector<72x2xf32>, vector<2x256xf32>, vector<72x256xf32> -> vector<72x256xf32>
    %c0_3 = arith.constant 0 : index
    %c0_4 = arith.constant 0 : index
    %3 = vector.load %arg3[%c0_3, %c0_4] : memref<72x1xf32, #tpu.memory_space<vmem>>, vector<72x1xf32>
    %4 = vector.broadcast %3 : vector<72x1xf32> to vector<72x256xf32>
    %5 = arith.addf %2, %4 : vector<72x256xf32>
    %6 = math.tanh %5 : vector<72x256xf32>
    %7 = vector.extract_strided_slice %6 {offsets = [0, 0], sizes = [24, 256], strides = [1, 1]} : vector<72x256xf32> to vector<24x256xf32>
    %8 = vector.extract_strided_slice %6 {offsets = [24, 0], sizes = [24, 256], strides = [1, 1]} : vector<72x256xf32> to vector<24x256xf32>
    %9 = vector.extract_strided_slice %6 {offsets = [48, 0], sizes = [24, 256], strides = [1, 1]} : vector<72x256xf32> to vector<24x256xf32>
    %cst_5 = arith.constant 5.000000e-01 : f32
    %10 = vector.broadcast %cst_5 : f32 to vector<24x256xf32>
    %11 = arith.mulf %9, %10 : vector<24x256xf32>
    %cst_6 = arith.constant 1.000000e+00 : f32
    %12 = vector.broadcast %cst_6 : f32 to vector<24x256xf32>
    %13 = arith.subf %12, %11 : vector<24x256xf32>
    %14 = arith.mulf %13, %7 : vector<24x256xf32>
    %15 = arith.mulf %11, %8 : vector<24x256xf32>
    %16 = arith.addf %14, %15 : vector<24x256xf32>
    %c0_7 = arith.constant 0 : index
    %c0_8 = arith.constant 0 : index
    %17 = vector.load %arg4[%c0_7, %c0_8] : memref<24x24xf32, #tpu.memory_space<vmem>>, vector<24x24xf32>
    %cst_9 = arith.constant dense<0.000000e+00> : vector<24x256xf32>
    %18 = tpu.matmul %17, %16, %cst_9 {dimension_numbers = #tpu.dot_dimension_numbers<[1], [0], [0], [1], [0, 0, 1, 1], [], []>} : vector<24x24xf32>, vector<24x256xf32>, vector<24x256xf32> -> vector<24x256xf32>
    %c0_10 = arith.constant 0 : index
    %c0_11 = arith.constant 0 : index
    %19 = vector.load %arg5[%c0_10, %c0_11] : memref<24x1xf32, #tpu.memory_space<vmem>>, vector<24x1xf32>
    %20 = vector.broadcast %19 : vector<24x1xf32> to vector<24x256xf32>
    %21 = arith.addf %18, %20 : vector<24x256xf32>
    %22 = math.tanh %21 : vector<24x256xf32>
    %cst_12 = arith.constant 5.000000e-01 : f32
    %23 = vector.broadcast %cst_12 : f32 to vector<24x256xf32>
    %24 = arith.mulf %22, %23 : vector<24x256xf32>
    %cst_13 = arith.constant 1.000000e+00 : f32
    %25 = vector.broadcast %cst_13 : f32 to vector<24x256xf32>
    %26 = arith.subf %25, %24 : vector<24x256xf32>
    %27 = arith.mulf %26, %7 : vector<24x256xf32>
    %28 = arith.mulf %24, %8 : vector<24x256xf32>
    %29 = arith.addf %27, %28 : vector<24x256xf32>
    %c0_14 = arith.constant 0 : index
    %c0_15 = arith.constant 0 : index
    %30 = vector.load %arg6[%c0_14, %c0_15] : memref<1x24xf32, #tpu.memory_space<vmem>>, vector<1x24xf32>
    %cst_16 = arith.constant dense<0.000000e+00> : vector<1x256xf32>
    %31 = tpu.matmul %30, %29, %cst_16 {dimension_numbers = #tpu.dot_dimension_numbers<[1], [0], [0], [1], [0, 0, 1, 1], [], []>} : vector<1x24xf32>, vector<24x256xf32>, vector<1x256xf32> -> vector<1x256xf32>
    %c0_17 = arith.constant 0 : index
    %c0_18 = arith.constant 0 : index
    %32 = vector.load %arg7[%c0_17, %c0_18] : memref<1x256xf32, #tpu.memory_space<vmem>>, vector<1x256xf32>
    tpu.vector_store %arg7[%c0_17, %c0_18], %31 {strides = array<i32>} : memref<1x256xf32, #tpu.memory_space<vmem>>, vector<1x256xf32>,
    return
  }
  func.func @transform_0(%arg0: i32) -> (i32, i32) {
    %c0_i32 = arith.constant 0 : i32
    %c0_i32_0 = arith.constant 0 : i32
    return %c0_i32, %arg0 : i32, i32
  }
  func.func @transform_1(%arg0: i32) -> (i32, i32) {
    %c0_i32 = arith.constant 0 : i32
    %c0_i32_0 = arith.constant 0 : i32
    %c0_i32_1 = arith.constant 0 : i32
    return %c0_i32, %c0_i32_0 : i32, i32
  }
  func.func @transform_2(%arg0: i32) -> (i32, i32) {
    %c0_i32 = arith.constant 0 : i32
    %c0_i32_0 = arith.constant 0 : i32
    %c0_i32_1 = arith.constant 0 : i32
    return %c0_i32, %c0_i32_0 : i32, i32
  }
  func.func @transform_3(%arg0: i32) -> (i32, i32) {
    %c0_i32 = arith.constant 0 : i32
    %c0_i32_0 = arith.constant 0 : i32
    %c0_i32_1 = arith.constant 0 : i32
    return %c0_i32, %c0_i32_0 : i32, i32
  }
  func.func @transform_4(%arg0: i32) -> (i32, i32) {
    %c0_i32 = arith.constant 0 : i32
    %c0_i32_0 = arith.constant 0 : i32
    %c0_i32_1 = arith.constant 0 : i32
    return %c0_i32, %c0_i32_0 : i32, i32
  }
  func.func @transform_5(%arg0: i32) -> (i32, i32) {
    %c0_i32 = arith.constant 0 : i32
    %c0_i32_0 = arith.constant 0 : i32
    %c0_i32_1 = arith.constant 0 : i32
    return %c0_i32, %c0_i32_0 : i32, i32
  }
  func.func @transform_6(%arg0: i32) -> (i32, i32) {
    %c0_i32 = arith.constant 0 : i32
    %c0_i32_0 = arith.constant 0 : i32
    return %c0_i32, %arg0 : i32, i32
  }
}

</mosaic_0001>

<bundles_post_ra>
// kernel: tpu_custom_call.1
= control target key start
LH: loop header
LB: loop body
LE: loop exit
PB: predicated region body
PF: predicated region fallthrough
CT: control target
= control target key end

     0   :  { %vm125_vm0 = vcmask 1041408   ;;  %v663_v2 = vmov 0.0   ;;  %vm97_vm1 = vcmask 15360   ;;  %v664_v5 = vmov 0   ;;  %s866_s0 = inlined_call_operand.vmem [shape: f32[2,256], index: 0, kind: input, shape index: {}]   ;;  %s867_s1 = inlined_call_operand.vmem [shape: f32[72,2], index: 1, kind: input, shape index: {}]   ;;  %s868_s2 = inlined_call_operand.vmem [shape: f32[72,1], index: 2, kind: input, shape index: {}]   ;;  %s869_s3 = inlined_call_operand.vmem [shape: f32[24,24], index: 3, kind: input, shape index: {}]   ;;  %s870_s4 = inlined_call_operand.vmem [shape: f32[24,1], index: 4, kind: input, shape index: {}]   ;;  %s871_s5 = inlined_call_operand.vmem [shape: f32[1,24], index: 5, kind: input, shape index: {}]   ;;  %s872_s6 = inlined_call_operand.hbm [shape: f32[1,256], index: 6, kind: output, shape index: {}]  }
   0x1   :  { %v559_v0 = vld.sshfl [vmem:[%s866_s0] sm:$0x33 pattern:$0x76325410]  ;;  %194 = vmatprep.mubr.f32.mxu0 %v663_v2  ;;  %236 = vmatprep.mubr.f32.mxu1 %v663_v2  ;;  %v32_v4 = vld [vmem:[%s867_s1 + $0x38] sm:$0xff]  ;;  %v40_v6 = vld [vmem:[%s868_s2 + $0x30] sm:$0xff] }
   0x2   :  { %v96_v1 = vcombine.high %v559_v0, %v559_v0  ;;  %v25_v3 = vld [vmem:[%s867_s1] sm:$0xff]  ;;  %589 = vset.pattern.permute.xlu0 %v664_v5  ;;  %590 = vset.pattern.permute.xlu1 %v664_v5  ;;  %v26_v8 = vld [vmem:[%s867_s1 + $0x8] sm:$0xff]  ;;  %v41_v10 = vld [vmem:[%s868_s2 + $0x38] sm:$0xff] }
   0x3   :  { %v34_v7 = vld [vmem:[%s868_s2] sm:$0xff]  ;;  %75 = vperm.xlu0 %589, %v40_v6   ;;  %v35_v11 = vld [vmem:[%s868_s2 + $0x8] sm:$0xff] }
   0x4   :  { %560 = vmatprep.subr.msk.mxu0 %vm125_vm0, %v96_v1  ;;  %583 = vmatprep.subr.msk.mxu1 %vm125_vm0, %v96_v1  ;;  %v33_v9 = vld [vmem:[%s867_s1 + $0x40] sm:$0xff] }
   0x5   :  { %561 = vmatpush1.msk.msra.mxu0 %vm125_vm0, %v559_v0  ;;  %584 = vmatpush1.msk.msra.mxu1 %vm125_vm0, %v559_v0 }
   0x6   :  { %562 = vmatmul.mubr.msk.f32.vlgmr.msra.gmra.mrb[0].mxu0 %vm97_vm1, %v25_v3  ;;  %569 = vmatmul.mubr.msk.f32.vlgmr.msra.gmra.mrb[0].mxu1 %vm97_vm1, %v32_v4 }
   0x7   :  { %200 = vmatprep.mubr.f32.mxu0 %v663_v2  ;;  %242 = vmatprep.mubr.f32.mxu1 %v663_v2 }
   0x8   :  { %45 = vperm.xlu1 %590, %v34_v7  }
   0x9   :  { %11 = vsyncpa [#allocation3], 0  ;;  %v27_v12 = vld [vmem:[%s867_s1 + $0x10] sm:$0xff]  ;;  %80 = vperm.xlu0 %589, %v41_v10   ;;  %v37_v13 = vld [vmem:[%s868_s2 + $0x18] sm:$0xff]  ;;  %vm318_vm2 = vcmask 195584   ;;  %s666_s19 = smov [#allocation2]  }
   0xa   :  { %563 = vmatmul.mubr.msk.f32.gmra.mrb[2].mxu0 %vm97_vm1, %v26_v8  ;;  %570 = vmatmul.mubr.msk.f32.gmra.mrb[2].mxu1 %vm97_vm1, %v33_v9  ;;  %v38_v14 = vld [vmem:[%s868_s2 + $0x20] sm:$0xff]  ;;  %v28_v15 = vld [vmem:[%s867_s1 + $0x18] sm:$0xff]  ;;  %v36_v17 = vld [vmem:[%s868_s2 + $0x10] sm:$0xff]  ;;  %s551_s20 = sshll.u32 %s666_s19, 4  ;;  %s552_s20 = int_to_ptr.vmem [resolvable:$true] %s551_s20 }
   0xb   :  { %206 = vmatprep.mubr.f32.mxu0 %v663_v2  ;;  %392 = vmatprep.mubr.f32.mxu1 %v663_v2  ;;  %v42_v16 = vld [vmem:[%s868_s2 + $0x40] sm:$0xff]  ;;  %v39_v19 = vld [vmem:[%s868_s2 + $0x28] sm:$0xff]  ;;  %v302_v23 = vld [vmem:[%s870_s4 + $0x10] sm:$0xff]  ;;  %p644_p1 = scmp.lt.s32.totalorder %s552_s20, %s552_s20 }
   0xc   :  { %50 = vperm.xlu1 %590, %v35_v11   ;;  %v29_v18 = vld [vmem:[%s867_s1 + $0x20] sm:$0xff]  ;;  %v30_v21 = vld [vmem:[%s867_s1 + $0x28] sm:$0xff]  ;;  %v31_v24 = vld [vmem:[%s867_s1 + $0x30] sm:$0xff] }
   0xd   :  { %60 = vperm.xlu0 %589, %v37_v13   ;;  %v300_v20 = vld [vmem:[%s870_s4] sm:$0xff]  ;;  %v301_v22 = vld [vmem:[%s870_s4 + $0x8] sm:$0xff] }
   0xe   :  { %564 = vmatmul.mubr.msk.f32.gmra.mrb[4].mxu0 %vm97_vm1, %v27_v12 }
   0xf   :  { %212 = vmatprep.mubr.f32.mxu0 %v663_v2 }
  0x10   :  { %65 = vperm.xlu1 %590, %v38_v14  }
  0x11   :  { %85 = vperm.xlu0 %589, %v42_v16  }
  0x12   :  { %565 = vmatmul.mubr.msk.f32.gmra.mrb[6].mxu0 %vm97_vm1, %v28_v15 }
  0x13   :  { %218 = vmatprep.mubr.f32.mxu0 %v663_v2 }
  0x14   :  { %55 = vperm.xlu1 %590, %v36_v17  }
  0x15   :  { %70 = vperm.xlu0 %589, %v39_v19  }
  0x16   :  { %566 = vmatmul.mubr.msk.f32.gmra.mrb[8].mxu0 %vm97_vm1, %v29_v18 }
  0x17   :  { %224 = vmatprep.mubr.f32.mxu0 %v663_v2 }
  0x18   :  { %305 = vperm.xlu1 %590, %v300_v20  }
  0x19   :  { %310 = vperm.xlu0 %589, %v301_v22  }
  0x1a   :  { %567 = vmatmul.mubr.msk.f32.gmra.mrb[10].mxu0 %vm97_vm1, %v30_v21 }
  0x1b   :  { %230 = vmatprep.mubr.f32.mxu0 %v663_v2 }
  0x1c   :  { %315 = vperm.xlu1 %590, %v302_v23  }
  0x1e   :  { %568 = vmatmul.mubr.msk.f32.gmra.mrb[12].mxu0 %vm97_vm1, %v31_v24 }
  0x82   :  { %v76_v25 = vpop.permute.xlu0 %75 }
  0x87   :  { %v46_v35 = vpop.permute.xlu1 %45 }
  0x88   :  { %v81_v30 = vpop.permute.xlu0 %80 }
  0x8b   :  { %v51_v41 = vpop.permute.xlu1 %50 }
  0x8c   :  { %v61_v38 = vpop.permute.xlu0 %60 }
  0x8f   :  { %v66_v51 = vpop.permute.xlu1 %65 }
  0x90   :  { %v86_v45 = vpop.permute.xlu0 %85 }
  0x93   :  { %v56_v63 = vpop.permute.xlu1 %55 }
  0x94   :  { %v71_v1 = vpop.permute.xlu0 %70 }
  0xd9   :  { %v196_v26 = vpop.f32.mrb[0].mxu0  ;;  %v238_v27 = vpop.f32.mrb[0].mxu1 }
  0xda   :  { %v198_v28 = vpop.f32.mrb[1].mxu0  ;;  %v240_v29 = vpop.f32.mrb[1].mxu1  ;;  %v197_v42 = vadd.f32 %v196_v26, %v46_v35  ;;  %v239_v43 = vadd.f32 %v238_v27, %v81_v30 }
  0xdb   :  { %v199_v44 = vadd.f32 %v198_v28, %v46_v35  ;;  %v241_v47 = vadd.f32 %v240_v29, %v81_v30 }
  0xdc   :  { %591 = vtanh.f32 %v197_v42 }
  0xdd   :  { %v202_v31 = vpop.f32.mrb[2].mxu0  ;;  %v244_v32 = vpop.f32.mrb[2].mxu1  ;;  %593 = vtanh.f32 %v239_v43 }
  0xde   :  { %v204_v33 = vpop.f32.mrb[3].mxu0  ;;  %v246_v34 = vpop.f32.mrb[3].mxu1  ;;  %v203_v49 = vadd.f32 %v202_v31, %v51_v41  ;;  %v245_v50 = vadd.f32 %v244_v32, %v86_v45  ;;  %595 = vtanh.f32 %v199_v44 }
  0xdf   :  { %v247_v52 = vadd.f32 %v246_v34, %v86_v45  ;;  %597 = vtanh.f32 %v241_v47  ;;  %v205_v58 = vadd.f32 %v204_v33, %v51_v41 }
  0xe0   :  { %599 = vtanh.f32 %v203_v49 }
  0xe1   :  { %v208_v36 = vpop.f32.mrb[4].mxu0  ;;  %601 = vtanh.f32 %v245_v50 }
  0xe2   :  { %v210_v37 = vpop.f32.mrb[5].mxu0  ;;  %603 = vtanh.f32 %v247_v52  ;;  %v209_v12 = vadd.f32 %v208_v36, %v56_v63 }
  0xe3   :  { %v211_v7 = vadd.f32 %v210_v37, %v56_v63 }
  0xe5   :  { %v214_v39 = vpop.f32.mrb[6].mxu0 }
  0xe6   :  { %v216_v40 = vpop.f32.mrb[7].mxu0  ;;  %v215_v61 = vadd.f32 %v214_v39, %v61_v38  ;;  %v787_v3 = vpop.eup %591 }
  0xe7   :  { %v217_v0 = vadd.f32 %v216_v40, %v61_v38  ;;  %v594_v5 = vpop.eup %593 }
  0xe8   :  { %v789_v6 = vpop.eup %595  ;;  %v269_v14 = vmul.f32 0.5, %v594_v5 }
  0xe9   :  { %v220_v46 = vpop.f32.mrb[8].mxu0  ;;  %v598_v8 = vpop.eup %597 }
  0xea   :  { %v222_v48 = vpop.f32.mrb[9].mxu0  ;;  %v221_v54 = vadd.f32 %v220_v46, %v66_v51  ;;  %v791_v10 = vpop.eup %599  ;;  %v270_v16 = vmul.f32 0.5, %v598_v8  ;;  %v275_v20 = vsub.f32 1.0, %v269_v14 }
  0xeb   :  { %v223_v56 = vadd.f32 %v222_v48, %v66_v51  ;;  %v602_v11 = vpop.eup %601 }
  0xec   :  { %605 = vtanh.f32 %v221_v54  ;;  %v604_v13 = vpop.eup %603  ;;  %v276_v23 = vsub.f32 1.0, %v270_v16  ;;  %v271_v33 = vmul.f32 0.5, %v602_v11  ;;  %v281_v36 = vmul.f32 %v791_v10, %v275_v20 }
  0xed   :  { %v226_v53 = vpop.f32.mrb[10].mxu0  ;;  %607 = vtanh.f32 %v223_v56  ;;  %v272_v24 = vmul.f32 0.5, %v604_v13 }
  0xee   :  { %v228_v55 = vpop.f32.mrb[11].mxu0  ;;  %v227_v9 = vadd.f32 %v226_v53, %v71_v1  ;;  %v277_v48 = vsub.f32 1.0, %v271_v33 }
  0xef   :  { %v229_v4 = vadd.f32 %v228_v55, %v71_v1  ;;  %v278_v37 = vsub.f32 1.0, %v272_v24  ;;  %v311_v1 = vpop.permute.xlu0 %310 }
  0xf1   :  { %v232_v57 = vpop.f32.mrb[12].mxu0 }
  0xf2   :  { %v233_v59 = vadd.f32 %v232_v57, %v76_v25  ;;  %v234_v60 = vpop.f32.mrb[13].mxu0  ;;  %v297_v57 = vld [vmem:[%s869_s3] sm:$0xff] }
  0xf3   :  { %v235_v62 = vadd.f32 %v234_v60, %v76_v25  ;;  %v306_v60 = vpop.permute.xlu1 %305 }
  0xf4   :  { %609 = vtanh.f32 %v233_v59  ;;  %v299_v59 = vld [vmem:[%s869_s3 + $0x10] sm:$0xff] }
  0xf5   :  { %611 = vtanh.f32 %v235_v62 }
  0xf6   :  { %613 = vtanh.f32 %v205_v58  ;;  %v793_v15 = vpop.eup %605  ;;  %v298_v58 = vld [vmem:[%s869_s3 + $0x8] sm:$0xff] }
  0xf7   :  { %615 = vtanh.f32 %v215_v61  ;;  %v795_v17 = vpop.eup %607  ;;  %v287_v28 = vmul.f32 %v793_v15, %v269_v14 }
  0xf8   :  { %617 = vtanh.f32 %v217_v0  ;;  %v288_v31 = vmul.f32 %v795_v17, %v270_v16 }
  0xf9   :  { %619 = vtanh.f32 %v229_v4  ;;  %v293_v43 = vadd.f32 %v287_v28, %v281_v36 }
  0xfa   :  { %621 = vtanh.f32 %v211_v7 }
  0xfb   :  { %623 = vtanh.f32 %v227_v9  ;;  %v316_v9 = vpop.permute.xlu1 %315 }
  0xfc   :  { %625 = vtanh.f32 %v209_v12 }
  0xfe   :  { %v610_v18 = vpop.eup %609 }
  0xff   :  { %v612_v19 = vpop.eup %611  ;;  %v267_v21 = vmul.f32 0.5, %v610_v18 }
 0x100   :  { %v797_v22 = vpop.eup %613  ;;  %v268_v25 = vmul.f32 0.5, %v612_v19 }
 0x101   :  { %v799_v26 = vpop.eup %615  ;;  %v273_v27 = vsub.f32 1.0, %v267_v21  ;;  %v282_v40 = vmul.f32 %v797_v22, %v276_v23 }
 0x102   :  { %v802_v29 = vpop.eup %617  ;;  %v274_v30 = vsub.f32 1.0, %v268_v25  ;;  %v285_v35 = vmul.f32 %v799_v26, %v267_v21 }
 0x103   :  { %v805_v32 = vpop.eup %619  ;;  %v279_v34 = vmul.f32 %v787_v3, %v273_v27  ;;  %v286_v39 = vmul.f32 %v802_v29, %v268_v25  ;;  %v294_v46 = vadd.f32 %v288_v31, %v282_v40 }
 0x104   :  { %v280_v38 = vmul.f32 %v789_v6, %v274_v30  ;;  %v813_v41 = vpop.eup %621  ;;  %v290_v47 = vmul.f32 %v805_v32, %v272_v24 }
 0x105   :  { %v291_v42 = vadd.f32 %v285_v35, %v279_v34  ;;  %v815_v44 = vpop.eup %623  ;;  %v284_v52 = vmul.f32 %v813_v41, %v278_v37 }
 0x106   :  { %v292_v45 = vadd.f32 %v286_v39, %v280_v38  ;;  %v818_v50 = vpop.eup %625  ;;  %v289_v53 = vmul.f32 %v815_v44, %v271_v33 }
 0x107   :  { %v577_v49 = vpack.c.bf16 %v293_v43, %v291_v42  ;;  %v296_v54 = vadd.f32 %v290_v47, %v284_v52  ;;  %v283_v55 = vmul.f32 %v818_v50, %v277_v48 }
 0x108   :  { %v575_v51 = vpack.c.bf16 %v294_v46, %v292_v45 }
 0x109   :  { %v295_v56 = vadd.f32 %v289_v53, %v283_v55  ;;  %v447_v53 = vld [vmem:[%s871_s5] sm:$0x1]  ;;  %v528_v55 = vlaneseq  ;;  %s639_s5 = scalar_lea.vmem %s552_s20, 32 }
 0x10a   :  { %576 = vmatprep.subr.bf16.mxu1 %v575_v51  ;;  %p640_p0 = scmp.ne.s32.totalorder %s552_s20, %s639_s5  ;;  %p645_p2 = scmp.lt.s32.totalorder %s639_s5, %s639_s5 }
 0x10b   :  { %578 = vmatpush1.bf16.msra.mxu1 %v577_v49  ;;  %vm542_vm3 = vcmp.lt.s32.totalorder %v528_v55, 256 }
 0x10c   :  { %332 = vmatprep.subr.mxu1 %v296_v54  ;;  %p646_p3 = por %p645_p2, %p644_p1 }
 0x10e   :  { %p647_p4 = pnand %p646_p3, %p640_p0 }
 0x10f   :  { %333 = vmatpush1.msra.mxu1 %v295_v56  ;;  %v529_v56 = vshrl.u32 %v528_v55, 7 }
 0x110   :  { %571 = vmatmul.mubr.msk.f32.vlgmr.msra.gmra.mrb[4].mxu1 %vm318_vm2, %v297_v57 }
 0x111   :  { %398 = vmatprep.mubr.f32.mxu1 %v663_v2 }
 0x114   :  { %572 = vmatmul.mubr.msk.f32.gmra.mrb[6].mxu1 %vm318_vm2, %v298_v58 }
 0x115   :  { %404 = vmatprep.mubr.f32.mxu1 %v663_v2 }
 0x118   :  { %573 = vmatmul.mubr.msk.f32.gmra.mrb[8].mxu1 %vm318_vm2, %v299_v59 }
 0x119   :  { %515 = vmatprep.mubr.f32.mxu1 %v663_v2 }
 0x1e3   :  { %v394_v61 = vpop.f32.mrb[4].mxu1 }
 0x1e4   :  { %v395_v62 = vadd.f32 %v394_v61, %v306_v60  ;;  %v396_v63 = vpop.f32.mrb[5].mxu1 }
 0x1e5   :  { %v397_v0 = vadd.f32 %v396_v63, %v306_v60 }
 0x1e6   :  { %627 = vtanh.f32 %v395_v62 }
 0x1e7   :  { %629 = vtanh.f32 %v397_v0  ;;  %v400_v4 = vpop.f32.mrb[6].mxu1 }
 0x1e8   :  { %v401_v5 = vadd.f32 %v400_v4, %v311_v1  ;;  %v402_v7 = vpop.f32.mrb[7].mxu1 }
 0x1e9   :  { %v403_v8 = vadd.f32 %v402_v7, %v311_v1 }
 0x1ea   :  { %631 = vtanh.f32 %v401_v5 }
 0x1eb   :  { %633 = vtanh.f32 %v403_v8  ;;  %v406_v11 = vpop.f32.mrb[8].mxu1 }
 0x1ec   :  { %v407_v12 = vadd.f32 %v406_v11, %v316_v9  ;;  %v408_v13 = vpop.f32.mrb[9].mxu1 }
 0x1ed   :  { %v409_v14 = vadd.f32 %v408_v13, %v316_v9 }
 0x1ee   :  { %635 = vtanh.f32 %v407_v12 }
 0x1ef   :  { %637 = vtanh.f32 %v409_v14 }
 0x1f0   :  { %v628_v2 = vpop.eup %627 }
 0x1f1   :  { %v630_v16 = vpop.eup %629  ;;  %v417_v18 = vmul.f32 0.5, %v628_v2 }
 0x1f2   :  { %v418_v19 = vmul.f32 0.5, %v630_v16 }
 0x1f3   :  { %v423_v20 = vsub.f32 1.0, %v417_v18  ;;  %v435_v36 = vmul.f32 %v799_v26, %v417_v18 }
 0x1f4   :  { %v632_v21 = vpop.eup %631  ;;  %v424_v23 = vsub.f32 1.0, %v418_v19  ;;  %v436_v40 = vmul.f32 %v802_v29, %v418_v19 }
 0x1f5   :  { %v634_v24 = vpop.eup %633  ;;  %v419_v25 = vmul.f32 0.5, %v632_v21  ;;  %v429_v28 = vmul.f32 %v787_v3, %v423_v20 }
 0x1f6   :  { %v420_v27 = vmul.f32 0.5, %v634_v24  ;;  %v430_v33 = vmul.f32 %v789_v6, %v424_v23 }
 0x1f7   :  { %v425_v30 = vsub.f32 1.0, %v419_v25  ;;  %v437_v38 = vmul.f32 %v793_v15, %v419_v25  ;;  %v441_v45 = vadd.f32 %v435_v36, %v429_v28 }
 0x1f8   :  { %v636_v31 = vpop.eup %635  ;;  %v426_v34 = vsub.f32 1.0, %v420_v27  ;;  %v438_v43 = vmul.f32 %v795_v17, %v420_v27  ;;  %v442_v48 = vadd.f32 %v436_v40, %v430_v33 }
 0x1f9   :  { %v638_v35 = vpop.eup %637  ;;  %v431_v37 = vmul.f32 %v791_v10, %v425_v30  ;;  %v421_v39 = vmul.f32 0.5, %v636_v31 }
 0x1fa   :  { %v432_v42 = vmul.f32 %v797_v22, %v426_v34  ;;  %v422_v3 = vmul.f32 0.5, %v638_v35 }
 0x1fb   :  { %v443_v46 = vadd.f32 %v437_v38, %v431_v37  ;;  %v427_v47 = vsub.f32 1.0, %v421_v39  ;;  %v439_v22 = vmul.f32 %v815_v44, %v421_v39 }
 0x1fc   :  { %v428_v6 = vsub.f32 1.0, %v422_v3  ;;  %v444_v49 = vadd.f32 %v438_v43, %v432_v42  ;;  %v440_v26 = vmul.f32 %v805_v32, %v422_v3  ;;  %v665_v32 = vmov 1966171168  }
 0x1fd   :  { %v581_v51 = vpack.c.bf16 %v443_v46, %v441_v45  ;;  %v433_v52 = vmul.f32 %v818_v50, %v427_v47  ;;  %v526_v54 = vunpack.c.l.s4 %v665_v32 }
 0x1fe   :  { %v579_v10 = vpack.c.bf16 %v444_v49, %v442_v48  ;;  %v434_v15 = vmul.f32 %v813_v41, %v428_v6 }
 0x1ff   :  { %v445_v17 = vadd.f32 %v439_v22, %v433_v52  ;;  %v527_v41 = vunpack.c.0.s8 %v526_v54 }
 0x200   :  { %580 = vmatprep.subr.bf16.mxu1 %v579_v10  ;;  %v446_v29 = vadd.f32 %v440_v26, %v434_v15 }
 0x201   :  { %582 = vmatpush1.bf16.msra.mxu1 %v581_v51  ;;  %v530_v57 = vsub.s32 %v527_v41, %v529_v56 }
 0x202   :  { %455 = vmatprep.subr.mxu1 %v446_v29 }
 0x205   :  { %456 = vmatpush1.msra.mxu1 %v445_v17 }
 0x206   :  { %574 = vmatmul.mubr.msk.f32.vlgmr.msra.gmra.mrb[10].mxu1 %vm318_vm2, %v447_v53 }
 0x2d9   :  { %v517_v50 = vpop.f32.mrb[10].mxu1 }
 0x2da   :  { %v519_v58 = vpop.f32.mrb[11].mxu1 }
 0x2db   :  { %v524_v59 = vcombine.low %v517_v50, %v519_v58 }
 0x2dd   :  { %v531_v44 = vrot.slane %v524_v59, %v530_v57 }
 0x2df   :  { %v538_v60 = vrot.slane %v531_v44, %v530_v57 }
 0x2e1   :  { %544 = vst.msk [vmem:[#allocation2] sm:$0x3] %vm542_vm3, %v538_v60 }
 0x2e2   :  { %650 = shalt.err (!%p647_p4)
}
 0x2e3   :  { %s651_s23 = scalar_lea.hbm %s872_s6, 32 }
 0x2e4   :  { %p652_p5 = scmp.ne.s32.totalorder %s872_s6, %s651_s23  ;;  %p655_p6 = scmp.lt.u32.totalorder %s651_s23, %s872_s6 }
 0x2e6   :  { %p657_p7 = pnand %p655_p6, %p652_p5 }
 0x2e8   :  { %660 = shalt.err (!%p657_p7)
}
 0x2e9   :  { %554 = dma.vmem_to_hbm [thread:$0]  %s552_s20, 32, %s872_s6, [#allocation3]  }
 0x2ea   :  { %661 = dma.done.wait [#allocation3], 32  }
 0x2eb   :  { %662 = vsyncadd [#allocation3], 4294967264 }
 0x2ec   :  { %558 = vsyncpa [#allocation3], 1 }

</bundles_post_ra>
